<compile_context>
chip_gen: v7x
topology: tpu7x:2x2x1
jax: 0.10.0
libtpu: 0.0.40
codegen_flags: <defaults>
</compile_context>

<pallas_src>
import functools

import jax
import jax.numpy as jnp
from jax.experimental import pallas as pl
from jax.experimental.pallas import tpu as pltpu


def _crelu_kernel(x_ref, bias_ref, o_ref, *, eps):
    # x_ref/o_ref: (2, row_tile, lane_tile); bias_ref: (row_tile, 128)
    re = x_ref[0].astype(jnp.float32)
    im = x_ref[1].astype(jnp.float32)
    bias = bias_ref[...][:, :1]                       # (row_tile, 1) per-row bias

    magn = jnp.sqrt(re * re + im * im)
    # max(magn - bias, 0) / (magn + eps): identical to the reference where()
    # since the denominator is strictly positive.  Exact divide (not approx
    # vrcp) -- mem-bound op, so the precision is free.
    scale = jnp.maximum(magn - bias, 0.0) / (magn + eps)

    o_ref[0] = (re * scale).astype(o_ref.dtype)
    o_ref[1] = (im * scale).astype(o_ref.dtype)


def _round_up(a, m):
    return -(-a // m) * m


def _pick_tiles(R, L, itemsize, sub):
    """Pick (row_tile, lane_tile) in bytes, per chip generation."""
    try:
        dk = jax.devices()[0].device_kind.lower()
    except Exception:  # pragma: no cover - e.g. no device
        dk = ""
    if "v7" in dk:
        target, two_tc = 4 << 20, True     # fits 32 MiB scoped default, no flags
    elif "v6" in dk:
        target, two_tc = 4 << 20, False
    else:                                   # v5e or unknown/interpret: conservative
        target, two_tc = 2 << 20, False

    row_bytes = 2 * L * itemsize            # one row of the (2, R, L) slab

    if sub * row_bytes <= target:
        # Preferred: full-L lane blocks (one fully contiguous DMA per component),
        # grow the row tile to fill the byte budget.
        lt = L
        rt_budget = max(sub, (target // row_bytes) // sub * sub)
        rt = R if rt_budget >= R else rt_budget
        # v7x has 2 TensorCores: keep >=2 grid steps along a parallel axis.
        if two_tc and rt >= R and R > sub:
            half = _round_up(-(-R // 2), sub)
            if half < R:
                rt = max(sub, half)
    else:
        # A single sub-row stripe of full L is already over budget: split lanes.
        rt = R if R < sub else sub
        lt_budget = max(128, (target // (2 * rt * itemsize)) // 128 * 128)
        lt = L if lt_budget >= L else lt_budget
    return rt, lt


def crelu_pallas(x, bias, eps=0.001):
    """x: (2, B, C, H, W); bias: (1, 1, C, 1, 1). Returns same shape as x."""
    two, B, C, H, W = x.shape
    assert two == 2
    R, L = B * C, H * W
    dtype = x.dtype

    # sublane tile depends on dtype (f32: 8, bf16: 16)
    if dtype == jnp.float32:
        sub, itemsize = 8, 4
    elif dtype == jnp.bfloat16:
        sub, itemsize = 16, 2
    else:
        raise NotImplementedError(f"unsupported dtype {dtype}")

    # single free reshape: (2, B, C, H, W) -> (2, R, L).  No padding, no slice.
    x2 = x.reshape(2, R, L)

    rt, lt = _pick_tiles(R, L, itemsize, sub)
    grid = (pl.cdiv(R, rt), pl.cdiv(L, lt))

    # tiny lane-dense per-row bias slab: row r = b*C + c holds bias[c]
    bias_rows = jnp.broadcast_to(
        bias.reshape(1, C, 1).astype(jnp.float32), (B, C, 128)).reshape(R, 128)

    x_spec = pl.BlockSpec((2, rt, lt), lambda i, j: (0, i, j))
    b_spec = pl.BlockSpec((rt, 128), lambda i, j: (i, 0))

    # advisory cost hint: purely memory-bound custom call
    bytes_accessed = 2 * (2 * R * L * itemsize) + R * 128 * 4
    cost = pl.CostEstimate(flops=10 * R * L, transcendentals=2 * R * L,
                           bytes_accessed=bytes_accessed)

    out = pl.pallas_call(
        functools.partial(_crelu_kernel, eps=eps),
        out_shape=jax.ShapeDtypeStruct((2, R, L), dtype),
        grid_spec=pltpu.PrefetchScalarGridSpec(
            num_scalar_prefetch=0,
            grid=grid,
            in_specs=[x_spec, b_spec],
            out_specs=x_spec,
        ),
        compiler_params=pltpu.CompilerParams(
            dimension_semantics=("parallel", "parallel")),
        cost_estimate=cost,
    )(x2, bias_rows)

    return out.reshape(2, B, C, H, W)


def crelu_reference(x, bias, eps=0.001):
    magn = jnp.sqrt(jnp.sum(x * x, axis=0, keepdims=True))   # (1, B, C, H, W)
    normalized = x / (magn + eps)
    magn_biased = magn - bias                                 # bias (1,1,C,1,1)
    return jnp.where(magn_biased > 0, normalized * magn_biased, 0.0)


if __name__ == "__main__":
    key = jax.random.PRNGKey(0)
    kx, kb = jax.random.split(key)

    # sum(repr) == 4 channels; small shapes
    B, C, H, W = 2, 4, 16, 16
    x = jax.random.normal(kx, (2, B, C, H, W), dtype=jnp.float32)

    # bias ~ Exponential(rate=1.17), positive (mimics bias.exponential_(1.17))
    bias = (jax.random.exponential(kb, (1, 1, C, 1, 1)) / 1.17).astype(jnp.float32)

    out = crelu_pallas(x, bias)
    out = jax.block_until_ready(out)

    ref = crelu_reference(x, bias)
    assert out.shape == x.shape
    max_err = float(jnp.max(jnp.abs(out - ref)))
    assert jnp.allclose(out, ref, atol=1e-5, rtol=1e-5), max_err

    print("KERNEL_OK")
</pallas_src>

<mosaic_0001>
module attributes {stable_mosaic.version = 11 : i64} {
  func.func @_crelu_kernel(%arg0: i32, %arg1: i32, %arg2: memref<2x8x256xf32, #tpu.memory_space<vmem>>, %arg3: memref<8x128xf32, #tpu.memory_space<vmem>>, %arg4: memref<2x8x256xf32, #tpu.memory_space<vmem>>) attributes {dimension_semantics = [#tpu.dimension_semantics<parallel>, #tpu.dimension_semantics<parallel>], iteration_bounds = array<i64: 1, 1>, scalar_prefetch = 0 : i64, scratch_operands = 0 : i64, tpu.core_type = #tpu.core_type<tc>, window_params = [{transform_indices = @transform_0, window_bounds = array<i64: 2, 8, 256>}, {transform_indices = @transform_1, window_bounds = array<i64: 8, 128>}, {transform_indices = @transform_2, window_bounds = array<i64: 2, 8, 256>}]} {
    %c0 = arith.constant 0 : index
    %c0_0 = arith.constant 0 : index
    %c0_1 = arith.constant 0 : index
    %0 = vector.load %arg2[%c0, %c0_0, %c0_1] : memref<2x8x256xf32, #tpu.memory_space<vmem>>, vector<1x8x256xf32>
    %1 = vector.shape_cast %0 : vector<1x8x256xf32> to vector<8x256xf32>
    %c1 = arith.constant 1 : index
    %c0_2 = arith.constant 0 : index
    %c0_3 = arith.constant 0 : index
    %2 = vector.load %arg2[%c1, %c0_2, %c0_3] : memref<2x8x256xf32, #tpu.memory_space<vmem>>, vector<1x8x256xf32>
    %3 = vector.shape_cast %2 : vector<1x8x256xf32> to vector<8x256xf32>
    %c0_4 = arith.constant 0 : index
    %c0_5 = arith.constant 0 : index
    %4 = vector.load %arg3[%c0_4, %c0_5] : memref<8x128xf32, #tpu.memory_space<vmem>>, vector<8x128xf32>
    %5 = vector.extract_strided_slice %4 {offsets = [0, 0], sizes = [8, 1], strides = [1, 1]} : vector<8x128xf32> to vector<8x1xf32>
    %6 = arith.mulf %1, %1 : vector<8x256xf32>
    %7 = arith.mulf %3, %3 : vector<8x256xf32>
    %8 = arith.addf %6, %7 : vector<8x256xf32>
    %9 = math.sqrt %8 : vector<8x256xf32>
    %10 = vector.broadcast %5 : vector<8x1xf32> to vector<8x256xf32>
    %11 = arith.subf %9, %10 : vector<8x256xf32>
    %cst = arith.constant 0.000000e+00 : f32
    %12 = vector.broadcast %cst : f32 to vector<8x256xf32>
    %13 = arith.maximumf %11, %12 : vector<8x256xf32>
    %cst_6 = arith.constant 1.000000e-03 : f32
    %14 = vector.broadcast %cst_6 : f32 to vector<8x256xf32>
    %15 = arith.addf %9, %14 : vector<8x256xf32>
    %16 = arith.divf %13, %15 : vector<8x256xf32>
    %17 = arith.mulf %1, %16 : vector<8x256xf32>
    %c0_7 = arith.constant 0 : index
    %c0_8 = arith.constant 0 : index
    %c0_9 = arith.constant 0 : index
    %18 = vector.load %arg4[%c0_7, %c0_8, %c0_9] : memref<2x8x256xf32, #tpu.memory_space<vmem>>, vector<1x8x256xf32>
    %19 = vector.shape_cast %18 : vector<1x8x256xf32> to vector<8x256xf32>
    %20 = vector.shape_cast %17 : vector<8x256xf32> to vector<1x8x256xf32>
    tpu.vector_store %arg4[%c0_7, %c0_8, %c0_9], %20 {strides = array<i32>} : memref<2x8x256xf32, #tpu.memory_space<vmem>>, vector<1x8x256xf32>,
    %21 = arith.mulf %3, %16 : vector<8x256xf32>
    %c1_10 = arith.constant 1 : index
    %c0_11 = arith.constant 0 : index
    %c0_12 = arith.constant 0 : index
    %22 = vector.load %arg4[%c1_10, %c0_11, %c0_12] : memref<2x8x256xf32, #tpu.memory_space<vmem>>, vector<1x8x256xf32>
    %23 = vector.shape_cast %22 : vector<1x8x256xf32> to vector<8x256xf32>
    %24 = vector.shape_cast %21 : vector<8x256xf32> to vector<1x8x256xf32>
    tpu.vector_store %arg4[%c1_10, %c0_11, %c0_12], %24 {strides = array<i32>} : memref<2x8x256xf32, #tpu.memory_space<vmem>>, vector<1x8x256xf32>,
    return
  }
  func.func @transform_0(%arg0: i32, %arg1: i32) -> (i32, i32, i32) {
    %c0_i32 = arith.constant 0 : i32
    %c0_i32_0 = arith.constant 0 : i32
    return %c0_i32, %arg0, %arg1 : i32, i32, i32
  }
  func.func @transform_1(%arg0: i32, %arg1: i32) -> (i32, i32) {
    %c0_i32 = arith.constant 0 : i32
    %c0_i32_0 = arith.constant 0 : i32
    return %arg0, %c0_i32 : i32, i32
  }
  func.func @transform_2(%arg0: i32, %arg1: i32) -> (i32, i32, i32) {
    %c0_i32 = arith.constant 0 : i32
    %c0_i32_0 = arith.constant 0 : i32
    return %c0_i32, %arg0, %arg1 : i32, i32, i32
  }
}

</mosaic_0001>

<bundles_post_ra>
// kernel: tpu_custom_call.1
= control target key start
LH: loop header
LB: loop body
LE: loop exit
PB: predicated region body
PF: predicated region fallthrough
CT: control target
= control target key end

     0   :  { %7 = vsyncpa [#allocation3], 0  ;;  %s256_s0 = inlined_call_operand.hbm [shape: f32[2,8,256], index: 0, kind: input, shape index: {}]   ;;  %s257_s1 = inlined_call_operand.hbm [shape: f32[8,128], index: 1, kind: input, shape index: {}]   ;;  %s258_s2 = inlined_call_operand.hbm [shape: f32[2,8,256], index: 2, kind: output, shape index: {}]  }
   0x1   :  { %8 = vsyncpa [#allocation6], 0 }
   0x2   :  { %9 = vsyncpa [#allocation4], 0  ;;  %s193_s9 = smov [#allocation2]   ;;  %s121_s13 = scalar_lea.hbm %s256_s0, 512 }
   0x3   :  { %s15_s10 = sshll.u32 %s193_s9, 4  ;;  %p122_p0 = scmp.ne.s32.totalorder %s256_s0, %s121_s13  ;;  %s16_s10 = int_to_ptr.vmem [resolvable:$true] %s15_s10 }
   0x4   :  { %p125_p1 = scmp.lt.u32.totalorder %s121_s13, %s256_s0 }
   0x6   :  { %p127_p2 = pnand %p125_p1, %p122_p0 }
   0x8   :  { %130 = shalt.err (!%p127_p2)
}
   0x9   :  { %s131_s18 = scalar_lea.vmem %s16_s10, 512  ;;  %p136_p4 = scmp.lt.s32.totalorder %s16_s10, %s16_s10 }
   0xa   :  { %p132_p3 = scmp.ne.s32.totalorder %s16_s10, %s131_s18  ;;  %p137_p5 = scmp.lt.s32.totalorder %s131_s18, %s131_s18 }
   0xc   :  { %p138_p6 = por %p137_p5, %p136_p4 }
   0xe   :  { %p139_p7 = pnand %p138_p6, %p132_p3 }
  0x10   :  { %142 = shalt.err (!%p139_p7)
}
  0x11   :  { %s194_s19 = smov 256   ;;  %s195_s20 = smov 16  }
  0x12   :  { %21 = dma.hbm_to_vmem [thread:$0]  %s256_s0, 512, %s16_s10, [#allocation3], %s194_s19, %s194_s19, %s195_s20  }
  0x13   :  { %s196_s23 = smov [#allocation5]   ;;  %s143_s27 = scalar_lea.hbm %s257_s1, 128 }
  0x14   :  { %s28_s24 = sshll.u32 %s196_s23, 4  ;;  %p144_p8 = scmp.ne.s32.totalorder %s257_s1, %s143_s27  ;;  %s29_s24 = int_to_ptr.vmem [resolvable:$true] %s28_s24 }
  0x15   :  { %p147_p9 = scmp.lt.u32.totalorder %s143_s27, %s257_s1 }
  0x17   :  { %p149_p10 = pnand %p147_p9, %p144_p8 }
  0x19   :  { %152 = shalt.err (!%p149_p10)
}
  0x1a   :  { %s153_s4 = scalar_lea.vmem %s29_s24, 128  ;;  %p158_p12 = scmp.lt.s32.totalorder %s29_s24, %s29_s24 }
  0x1b   :  { %p154_p11 = scmp.ne.s32.totalorder %s29_s24, %s153_s4  ;;  %p159_p13 = scmp.lt.s32.totalorder %s153_s4, %s153_s4 }
  0x1d   :  { %p160_p0 = por %p159_p13, %p158_p12 }
  0x1f   :  { %p161_p1 = pnand %p160_p0, %p154_p11 }
  0x21   :  { %164 = shalt.err (!%p161_p1)
}
  0x22   :  { %31 = dma.hbm_to_vmem [thread:$0]  %s257_s1, 128, %s29_s24, [#allocation6]  }
  0x23   :  { %187 = dma.done.wait [#allocation3], 512  }
  0x24   :  { %188 = vsyncadd [#allocation3], 4294966784 }
  0x25   :  { %189 = dma.done.wait [#allocation6], 128  }
  0x26   :  { %190 = vsyncadd [#allocation6], 4294967168  ;;  %v197_v0 = vmov 0   ;;  %v43_v1 = vld [vmem:[#allocation5] sm:$0xff]  ;;  %v41_v3 = vld [vmem:[#allocation2 + $0x10] sm:$0xff]  ;;  %s198_s1 = smov [#allocation7]  }
  0x27   :  { %112 = vset.pattern.permute.xlu0 %v197_v0  ;;  %v38_v2 = vld [vmem:[#allocation2] sm:$0xff]  ;;  %v39_v4 = vld [vmem:[#allocation2 + $0x8] sm:$0xff]  ;;  %v42_v5 = vld [vmem:[#allocation2 + $0x18] sm:$0xff]  ;;  %v46_v7 = vmul.f32 %v41_v3, %v41_v3  ;;  %s93_s6 = sshll.u32 %s198_s1, 4  ;;  %s94_s6 = int_to_ptr.vmem [resolvable:$true] %s93_s6 }
  0x28   :  { %66 = vperm.xlu0 %112, %v43_v1   ;;  %v44_v6 = vmul.f32 %v38_v2, %v38_v2  ;;  %v45_v8 = vmul.f32 %v39_v4, %v39_v4  ;;  %v47_v9 = vmul.f32 %v42_v5, %v42_v5  ;;  %s165_s7 = scalar_lea.vmem %s94_s6, 512  ;;  %p170_p3 = scmp.lt.s32.totalorder %s94_s6, %s94_s6 }
  0x29   :  { %p166_p2 = scmp.ne.s32.totalorder %s94_s6, %s165_s7  ;;  %p171_p4 = scmp.lt.s32.totalorder %s165_s7, %s165_s7 }
  0x2a   :  { %v48_v10 = vadd.f32 %v46_v7, %v44_v6  ;;  %v49_v11 = vadd.f32 %v47_v9, %v45_v8 }
  0x2b   :  { %p172_p5 = por %p171_p4, %p170_p3 }
  0x2c   :  { %113 = vrsqrt.f32 %v48_v10  ;;  %vm52_vm0 = vcmp.eq.f32.partialorder %v48_v10, inf  ;;  %vm59_vm1 = vcmp.eq.f32.partialorder %v49_v11, inf  ;;  %v55_v16 = vand.u32 2147483648, %v48_v10 }
  0x2d   :  { %115 = vrsqrt.f32 %v49_v11  ;;  %vm54_vm2 = vcmp.eq.f32.partialorder %v48_v10, 0.0  ;;  %v62_v18 = vand.u32 2147483648, %v49_v11  ;;  %vm61_vm3 = vcmp.eq.f32.partialorder %v49_v11, 0.0  ;;  %p173_p6 = pnand %p172_p5, %p166_p2 }
  0x36   :  { %v114_v12 = vpop.eup %113 }
  0x37   :  { %v116_v13 = vpop.eup %115  ;;  %v51_v14 = vmul.f32 %v114_v12, %v48_v10 }
  0x38   :  { %v58_v15 = vmul.f32 %v116_v13, %v49_v11 }
  0x39   :  { %v53_v17 = vsel %vm52_vm0, %v48_v10, %v51_v14 }
  0x3a   :  { %v60_v19 = vsel %vm59_vm1, %v49_v11, %v58_v15  ;;  %v56_v20 = vsel %vm54_vm2, %v55_v16, %v53_v17 }
  0x3b   :  { %v63_v21 = vsel %vm61_vm3, %v62_v18, %v60_v19  ;;  %v73_v22 = vadd.f32 0.001, %v56_v20 }
  0x3c   :  { %v74_v23 = vadd.f32 0.001, %v63_v21 }
  0x3d   :  { %117 = vrcp.f32 %v73_v22 }
  0x3e   :  { %119 = vrcp.f32 %v74_v23 }
  0x47   :  { %v118_v25 = vpop.eup %117 }
  0x48   :  { %v120_v28 = vpop.eup %119 }
  0xa7   :  { %v67_v24 = vpop.permute.xlu0 %66 }
  0xa8   :  { %v69_v26 = vsub.f32 %v56_v20, %v67_v24  ;;  %v70_v27 = vsub.f32 %v63_v21, %v67_v24 }
  0xaa   :  { %v71_v29 = vmax.f32 %v69_v26, 0.0  ;;  %v72_v30 = vmax.f32 %v70_v27, 0.0 }
  0xac   :  { %v76_v31 = vmul.f32 %v118_v25, %v71_v29  ;;  %v78_v32 = vmul.f32 %v120_v28, %v72_v30 }
  0xae   :  { %v79_v33 = vmul.f32 %v76_v31, %v38_v2  ;;  %v80_v34 = vmul.f32 %v78_v32, %v39_v4  ;;  %v83_v35 = vmul.f32 %v76_v31, %v41_v3  ;;  %v84_v36 = vmul.f32 %v78_v32, %v42_v5 }
  0xb0   :  { %81 = vst [vmem:[#allocation7] sm:$0xff] %v79_v33  ;;  %82 = vst [vmem:[#allocation7 + $0x8] sm:$0xff] %v80_v34 }
  0xb1   :  { %86 = vst [vmem:[#allocation7 + $0x10] sm:$0xff] %v83_v35  ;;  %87 = vst [vmem:[#allocation7 + $0x18] sm:$0xff] %v84_v36 }
  0xb2   :  { %176 = shalt.err (!%p173_p6)
}
  0xb3   :  { %s177_s10 = scalar_lea.hbm %s258_s2, 512 }
  0xb4   :  { %p178_p7 = scmp.ne.s32.totalorder %s258_s2, %s177_s10  ;;  %p181_p8 = scmp.lt.u32.totalorder %s177_s10, %s258_s2 }
  0xb6   :  { %p183_p9 = pnand %p181_p8, %p178_p7 }
  0xb8   :  { %186 = shalt.err (!%p183_p9)
}
  0xb9   :  { %99 = dma.vmem_to_hbm [thread:$0]  %s94_s6, 512, %s258_s2, [#allocation4], %s194_s19, %s194_s19, %s195_s20  }
  0xba   :  { %191 = dma.done.wait [#allocation4], 512  }
  0xbb   :  { %192 = vsyncadd [#allocation4], 4294966784 }
  0xbc   :  { %103 = vsyncpa [#allocation3], 1 }
  0xbd   :  { %104 = vsyncpa [#allocation6], 1 }
  0xbe   :  { %105 = vsyncpa [#allocation4], 1 }

</bundles_post_ra>
